<compile_context>
chip_gen: v7x
topology: tpu7x:2x2x1
jax: 0.10.0
libtpu: 0.0.40
codegen_flags: <defaults>
</compile_context>

<pallas_src>
import functools

import jax
import jax.numpy as jnp
from jax.experimental import pallas as pl
from jax.experimental.pallas import tpu as pltpu

LANE = 128            # vreg lane width
BF16_SUBLANES = 16    # bf16 vregs pack 16 sublanes -> round batch tiles to 16


def _round_up(n, m):
    return (n + m - 1) // m * m


# --------------------------------------------------------------------------- #
# Kernel
# --------------------------------------------------------------------------- #
def mlp_kernel(x_ref,
               w1_ref, b1_ref,
               w2_ref, b2_ref,
               w3_ref, b3_ref,
               w4_ref, b4_ref,
               o_ref):
    """Fused 4-layer MLP (Linear+ReLU x3, then Linear) on one batch tile.

    x arrives in its original dtype and is cast to bf16 on the VMEM tile (first
    line).  Weights live in VMEM as bf16 (MXU-native); biases and accumulation
    are f32.  All feature dims are pre-padded to 128 lanes, so every vector op
    runs on dense, unmasked vregs, and the output store is a dense bf16 slab.
    """
    compute_dtype = w1_ref.dtype
    x = x_ref[...].astype(compute_dtype)               # cast inside the kernel

    h = jnp.dot(x, w1_ref[...], preferred_element_type=jnp.float32)
    h = jnp.maximum(h + b1_ref[...], 0.0).astype(compute_dtype)

    h = jnp.dot(h, w2_ref[...], preferred_element_type=jnp.float32)
    h = jnp.maximum(h + b2_ref[...], 0.0).astype(compute_dtype)

    h = jnp.dot(h, w3_ref[...], preferred_element_type=jnp.float32)
    h = jnp.maximum(h + b3_ref[...], 0.0).astype(compute_dtype)

    h = jnp.dot(h, w4_ref[...], preferred_element_type=jnp.float32)
    o_ref[...] = (h + b4_ref[...]).astype(o_ref.dtype)


# --------------------------------------------------------------------------- #
# Parameter preparation
# --------------------------------------------------------------------------- #
def pad_and_cast_params(params, compute_dtype=jnp.bfloat16):
    """Zero-pad every (W, b) to 128-lane multiples; cast W to bf16, keep b f32.

    Zero-padded rows/columns are inert through matmul + bias + ReLU, so the
    logical [:, :out_features] slice of the result is unchanged.
    """
    padded = []
    for w, b in params:
        fi, fo = w.shape
        fi_p, fo_p = _round_up(fi, LANE), _round_up(fo, LANE)
        w_p = jnp.zeros((fi_p, fo_p), compute_dtype).at[:fi, :fo].set(
            w.astype(compute_dtype))
        b_p = jnp.zeros((1, fo_p), jnp.float32).at[:, :fo].set(
            b.reshape(1, -1).astype(jnp.float32))
        padded.append((w_p, b_p))
    return padded


# --------------------------------------------------------------------------- #
# Tiling
# --------------------------------------------------------------------------- #
def _device_tiling_defaults():
    """(max_tile_b, num_tensorcores) per TPU generation."""
    try:
        kind = jax.devices()[0].device_kind.lower()
    except Exception:  # pragma: no cover - defensive default
        kind = ""
    if "v7" in kind:
        return 4096, 2     # 3.2 TB/s HBM: big tiles; 2 TCs share the grid
    if "v6" in kind:
        return 2048, 1     # single TC; amortize ~0.35 us/step overhead
    if "v5" in kind:
        return 1024, 1     # 512-1024 row tiles already hit ~85% of roofline
    return 1024, 1


def _choose_batch_tiling(batch, max_tile_b, num_cores):
    """No forced splits on 1-TC chips; split for megacore only when each core
    still gets a >=2048-row tile.  tile_b is rounded to 16 so bf16 (16,128)
    packing stays dense for any batch size."""
    num_steps = pl.cdiv(batch, max_tile_b)
    if num_cores > 1 and num_steps == 1 and batch >= num_cores * 2048:
        num_steps = num_cores
    tile_b = _round_up(pl.cdiv(batch, num_steps), BF16_SUBLANES)
    return tile_b, num_steps


# --------------------------------------------------------------------------- #
# Wrapper
# --------------------------------------------------------------------------- #
@functools.partial(jax.jit, static_argnames=("out_features",))
def digit_learner_forward(x, padded_params, out_features):
    """Forward pass of digitLearnerModel using a single fused Pallas kernel."""
    (w1, b1), (w2, b2), (w3, b3), (w4, b4) = padded_params
    B, in_f = x.shape
    in_p = w1.shape[0]          # layer-1 fan-in, padded to a lane multiple
    out_p = w4.shape[1]         # padded output width (128)

    # For 16x16 inputs in_f == in_p == 256, so this is a no-op; it only fires
    # for resolutions whose flattened size is not a 128 multiple (the padded
    # w1 rows are zero, so the pad must be real zeros, not garbage).
    if in_f != in_p:
        x = jnp.pad(x, ((0, 0), (0, in_p - in_f)))

    max_tile_b, num_cores = _device_tiling_defaults()
    tile_b, num_steps = _choose_batch_tiling(B, max_tile_b, num_cores)

    # Grid-invariant weight/bias blocks: index_map always returns (0, 0), so
    # Pallas only DMAs them once across the whole grid (~320 KiB total).
    def full(arr):
        return pl.BlockSpec(arr.shape, lambda i: (0, 0))

    # Advisory cost estimate (helps XLA schedule this small custom call).
    flops = 2 * B * sum(int(w.shape[0]) * int(w.shape[1])
                        for w, _ in padded_params)
    bytes_accessed = (
        x.size * x.dtype.itemsize
        + sum(w.size * w.dtype.itemsize + b.size * b.dtype.itemsize
              for w, b in padded_params)
        + B * out_p * 2)   # bf16 output slab

    # Note: x and the output are NOT padded in the batch dimension.  If B is
    # not a multiple of tile_b, the last block is read with padding and the
    # out-of-bounds output rows are masked on writeback by the pipeline.
    out_padded = pl.pallas_call(
        mlp_kernel,
        out_shape=jax.ShapeDtypeStruct((B, out_p), jnp.bfloat16),
        grid_spec=pl.GridSpec(
            grid=(num_steps,),
            in_specs=[
                pl.BlockSpec((tile_b, in_p), lambda i: (i, 0)),   # x tile
                full(w1), full(b1),
                full(w2), full(b2),
                full(w3), full(b3),
                full(w4), full(b4),
            ],
            out_specs=pl.BlockSpec((tile_b, out_p), lambda i: (i, 0)),
        ),
        compiler_params=pltpu.CompilerParams(
            dimension_semantics=("parallel",),
            vmem_limit_bytes=32 * 1024 * 1024),
        cost_estimate=pl.CostEstimate(
            flops=flops, transcendentals=0, bytes_accessed=bytes_accessed),
    )(x, w1, b1, w2, b2, w3, b3, w4, b4)

    # Drop the 118 zero output lanes -> logical (B, 10); upcast after the slice.
    return out_padded[:, :out_features].astype(jnp.float32)


# --------------------------------------------------------------------------- #
# Init + reference
# --------------------------------------------------------------------------- #
def init_linear(key, fan_in, fan_out, dtype=jnp.float32):
    """Mimic torch.nn.Linear default init: U(-1/sqrt(fan_in), 1/sqrt(fan_in)).

    Returns W of shape [fan_in, fan_out] (transposed vs. PyTorch) and b of
    shape [1, fan_out]."""
    kw, kb = jax.random.split(key)
    bound = 1.0 / jnp.sqrt(jnp.asarray(fan_in, dtype))
    w = jax.random.uniform(kw, (fan_in, fan_out), dtype, -bound, bound)
    b = jax.random.uniform(kb, (1, fan_out), dtype, -bound, bound)
    return w, b


def make_params(key, resolution):
    in_f = resolution[0] * resolution[1]
    dims = [(in_f, 60), (60, 15), (15, 15), (15, 10)]
    keys = jax.random.split(key, len(dims))
    return [init_linear(k, fi, fo) for k, (fi, fo) in zip(keys, dims)]


def reference_forward(x, params):
    """Pure-JAX reference matching the PyTorch forward (ReLU on hidden only)."""
    h = x
    for idx, (w, b) in enumerate(params):
        h = h.astype(jnp.float32) @ w.astype(jnp.float32) \
            + b.astype(jnp.float32).reshape(1, -1)
        if idx < len(params) - 1:
            h = jnp.maximum(h, 0.0)
    return h


# --------------------------------------------------------------------------- #
# Demo / self-test
# --------------------------------------------------------------------------- #
if __name__ == "__main__":
    resolution = (16, 16)          # 256 input features, as in digitLearnerModel
    batch = 16
    key = jax.random.PRNGKey(0)
    k_params, k_x = jax.random.split(key)

    params = make_params(k_params, resolution)        # f32 "PyTorch-like" params
    padded_params = pad_and_cast_params(params)       # bf16, lane-padded

    # The PyTorch forward consumes already-flattened inputs: [batch, R0*R1].
    x = jax.random.normal(k_x, (batch, resolution[0] * resolution[1]),
                          jnp.float32)

    out = digit_learner_forward(x, padded_params, out_features=10)
    out = jax.block_until_ready(out)
    assert out.shape == (batch, 10)

    # Loose check vs. the exact f32 reference (bf16 weights/activations/output
    # => relaxed tolerance).
    ref_f32 = reference_forward(x, params)
    assert jnp.allclose(out, ref_f32, rtol=5e-2, atol=5e-2), \
        "mismatch vs f32 reference"

    # Tighter check vs. a reference built from the same bf16-rounded operands.
    bf16_params = [(w.astype(jnp.bfloat16).astype(jnp.float32), b)
                   for w, b in params]
    ref_bf16 = reference_forward(
        x.astype(jnp.bfloat16).astype(jnp.float32), bf16_params)
    assert jnp.allclose(out, ref_bf16, rtol=3e-2, atol=3e-2), \
        "mismatch vs bf16-rounded reference"

    print("KERNEL_OK")
</pallas_src>

<mosaic_0001>
module attributes {stable_mosaic.version = 11 : i64} {
  func.func @mlp_kernel(%arg0: i32, %arg1: memref<16x256xf32, #tpu.memory_space<vmem>>, %arg2: memref<256x128xbf16, #tpu.memory_space<vmem>>, %arg3: memref<1x128xf32, #tpu.memory_space<vmem>>, %arg4: memref<128x128xbf16, #tpu.memory_space<vmem>>, %arg5: memref<1x128xf32, #tpu.memory_space<vmem>>, %arg6: memref<128x128xbf16, #tpu.memory_space<vmem>>, %arg7: memref<1x128xf32, #tpu.memory_space<vmem>>, %arg8: memref<128x128xbf16, #tpu.memory_space<vmem>>, %arg9: memref<1x128xf32, #tpu.memory_space<vmem>>, %arg10: memref<16x128xbf16, #tpu.memory_space<vmem>>) attributes {dimension_semantics = [#tpu.dimension_semantics<parallel>], iteration_bounds = array<i64: 1>, scalar_prefetch = 0 : i64, scratch_operands = 0 : i64, tpu.core_type = #tpu.core_type<tc>, window_params = [{transform_indices = @transform_0, window_bounds = array<i64: 16, 256>}, {pipeline_mode = #tpu.pipeline_mode<synchronous>, transform_indices = @transform_1, window_bounds = array<i64: 256, 128>}, {pipeline_mode = #tpu.pipeline_mode<synchronous>, transform_indices = @transform_2, window_bounds = array<i64: 1, 128>}, {pipeline_mode = #tpu.pipeline_mode<synchronous>, transform_indices = @transform_3, window_bounds = array<i64: 128, 128>}, {pipeline_mode = #tpu.pipeline_mode<synchronous>, transform_indices = @transform_4, window_bounds = array<i64: 1, 128>}, {pipeline_mode = #tpu.pipeline_mode<synchronous>, transform_indices = @transform_5, window_bounds = array<i64: 128, 128>}, {pipeline_mode = #tpu.pipeline_mode<synchronous>, transform_indices = @transform_6, window_bounds = array<i64: 1, 128>}, {pipeline_mode = #tpu.pipeline_mode<synchronous>, transform_indices = @transform_7, window_bounds = array<i64: 128, 128>}, {pipeline_mode = #tpu.pipeline_mode<synchronous>, transform_indices = @transform_8, window_bounds = array<i64: 1, 128>}, {transform_indices = @transform_9, window_bounds = array<i64: 16, 128>}]} {
    %c0 = arith.constant 0 : index
    %c0_0 = arith.constant 0 : index
    %0 = vector.load %arg1[%c0, %c0_0] : memref<16x256xf32, #tpu.memory_space<vmem>>, vector<16x256xf32>
    %1 = arith.truncf %0 : vector<16x256xf32> to vector<16x256xbf16>
    %c0_1 = arith.constant 0 : index
    %c0_2 = arith.constant 0 : index
    %2 = vector.load %arg2[%c0_1, %c0_2] : memref<256x128xbf16, #tpu.memory_space<vmem>>, vector<256x128xbf16>
    %cst = arith.constant dense<0.000000e+00> : vector<16x128xf32>
    %3 = tpu.matmul %1, %2, %cst {dimension_numbers = #tpu.dot_dimension_numbers<[1], [0], [0], [1], [0, 0, 1, 1], [], []>} : vector<16x256xbf16>, vector<256x128xbf16>, vector<16x128xf32> -> vector<16x128xf32>
    %c0_3 = arith.constant 0 : index
    %c0_4 = arith.constant 0 : index
    %4 = vector.load %arg3[%c0_3, %c0_4] : memref<1x128xf32, #tpu.memory_space<vmem>>, vector<1x128xf32>
    %5 = vector.broadcast %4 : vector<1x128xf32> to vector<16x128xf32>
    %6 = arith.addf %3, %5 : vector<16x128xf32>
    %cst_5 = arith.constant 0.000000e+00 : f32
    %7 = vector.broadcast %cst_5 : f32 to vector<16x128xf32>
    %8 = arith.maximumf %6, %7 : vector<16x128xf32>
    %9 = arith.truncf %8 : vector<16x128xf32> to vector<16x128xbf16>
    %c0_6 = arith.constant 0 : index
    %c0_7 = arith.constant 0 : index
    %10 = vector.load %arg4[%c0_6, %c0_7] : memref<128x128xbf16, #tpu.memory_space<vmem>>, vector<128x128xbf16>
    %cst_8 = arith.constant dense<0.000000e+00> : vector<16x128xf32>
    %11 = tpu.matmul %9, %10, %cst_8 {dimension_numbers = #tpu.dot_dimension_numbers<[1], [0], [0], [1], [0, 0, 1, 1], [], []>} : vector<16x128xbf16>, vector<128x128xbf16>, vector<16x128xf32> -> vector<16x128xf32>
    %c0_9 = arith.constant 0 : index
    %c0_10 = arith.constant 0 : index
    %12 = vector.load %arg5[%c0_9, %c0_10] : memref<1x128xf32, #tpu.memory_space<vmem>>, vector<1x128xf32>
    %13 = vector.broadcast %12 : vector<1x128xf32> to vector<16x128xf32>
    %14 = arith.addf %11, %13 : vector<16x128xf32>
    %cst_11 = arith.constant 0.000000e+00 : f32
    %15 = vector.broadcast %cst_11 : f32 to vector<16x128xf32>
    %16 = arith.maximumf %14, %15 : vector<16x128xf32>
    %17 = arith.truncf %16 : vector<16x128xf32> to vector<16x128xbf16>
    %c0_12 = arith.constant 0 : index
    %c0_13 = arith.constant 0 : index
    %18 = vector.load %arg6[%c0_12, %c0_13] : memref<128x128xbf16, #tpu.memory_space<vmem>>, vector<128x128xbf16>
    %cst_14 = arith.constant dense<0.000000e+00> : vector<16x128xf32>
    %19 = tpu.matmul %17, %18, %cst_14 {dimension_numbers = #tpu.dot_dimension_numbers<[1], [0], [0], [1], [0, 0, 1, 1], [], []>} : vector<16x128xbf16>, vector<128x128xbf16>, vector<16x128xf32> -> vector<16x128xf32>
    %c0_15 = arith.constant 0 : index
    %c0_16 = arith.constant 0 : index
    %20 = vector.load %arg7[%c0_15, %c0_16] : memref<1x128xf32, #tpu.memory_space<vmem>>, vector<1x128xf32>
    %21 = vector.broadcast %20 : vector<1x128xf32> to vector<16x128xf32>
    %22 = arith.addf %19, %21 : vector<16x128xf32>
    %cst_17 = arith.constant 0.000000e+00 : f32
    %23 = vector.broadcast %cst_17 : f32 to vector<16x128xf32>
    %24 = arith.maximumf %22, %23 : vector<16x128xf32>
    %25 = arith.truncf %24 : vector<16x128xf32> to vector<16x128xbf16>
    %c0_18 = arith.constant 0 : index
    %c0_19 = arith.constant 0 : index
    %26 = vector.load %arg8[%c0_18, %c0_19] : memref<128x128xbf16, #tpu.memory_space<vmem>>, vector<128x128xbf16>
    %cst_20 = arith.constant dense<0.000000e+00> : vector<16x128xf32>
    %27 = tpu.matmul %25, %26, %cst_20 {dimension_numbers = #tpu.dot_dimension_numbers<[1], [0], [0], [1], [0, 0, 1, 1], [], []>} : vector<16x128xbf16>, vector<128x128xbf16>, vector<16x128xf32> -> vector<16x128xf32>
    %c0_21 = arith.constant 0 : index
    %c0_22 = arith.constant 0 : index
    %28 = vector.load %arg9[%c0_21, %c0_22] : memref<1x128xf32, #tpu.memory_space<vmem>>, vector<1x128xf32>
    %29 = vector.broadcast %28 : vector<1x128xf32> to vector<16x128xf32>
    %30 = arith.addf %27, %29 : vector<16x128xf32>
    %31 = arith.truncf %30 : vector<16x128xf32> to vector<16x128xbf16>
    %c0_23 = arith.constant 0 : index
    %c0_24 = arith.constant 0 : index
    %32 = vector.load %arg10[%c0_23, %c0_24] : memref<16x128xbf16, #tpu.memory_space<vmem>>, vector<16x128xbf16>
    tpu.vector_store %arg10[%c0_23, %c0_24], %31 {strides = array<i32>} : memref<16x128xbf16, #tpu.memory_space<vmem>>, vector<16x128xbf16>,
    return
  }
  func.func @transform_0(%arg0: i32) -> (i32, i32) {
    %c0_i32 = arith.constant 0 : i32
    %c0_i32_0 = arith.constant 0 : i32
    return %arg0, %c0_i32 : i32, i32
  }
  func.func @transform_1(%arg0: i32) -> (i32, i32) {
    %c0_i32 = arith.constant 0 : i32
    %c0_i32_0 = arith.constant 0 : i32
    %c0_i32_1 = arith.constant 0 : i32
    return %c0_i32, %c0_i32_0 : i32, i32
  }
  func.func @transform_2(%arg0: i32) -> (i32, i32) {
    %c0_i32 = arith.constant 0 : i32
    %c0_i32_0 = arith.constant 0 : i32
    %c0_i32_1 = arith.constant 0 : i32
    return %c0_i32, %c0_i32_0 : i32, i32
  }
  func.func @transform_3(%arg0: i32) -> (i32, i32) {
    %c0_i32 = arith.constant 0 : i32
    %c0_i32_0 = arith.constant 0 : i32
    %c0_i32_1 = arith.constant 0 : i32
    return %c0_i32, %c0_i32_0 : i32, i32
  }
  func.func @transform_4(%arg0: i32) -> (i32, i32) {
    %c0_i32 = arith.constant 0 : i32
    %c0_i32_0 = arith.constant 0 : i32
    %c0_i32_1 = arith.constant 0 : i32
    return %c0_i32, %c0_i32_0 : i32, i32
  }
  func.func @transform_5(%arg0: i32) -> (i32, i32) {
    %c0_i32 = arith.constant 0 : i32
    %c0_i32_0 = arith.constant 0 : i32
    %c0_i32_1 = arith.constant 0 : i32
    return %c0_i32, %c0_i32_0 : i32, i32
  }
  func.func @transform_6(%arg0: i32) -> (i32, i32) {
    %c0_i32 = arith.constant 0 : i32
    %c0_i32_0 = arith.constant 0 : i32
    %c0_i32_1 = arith.constant 0 : i32
    return %c0_i32, %c0_i32_0 : i32, i32
  }
  func.func @transform_7(%arg0: i32) -> (i32, i32) {
    %c0_i32 = arith.constant 0 : i32
    %c0_i32_0 = arith.constant 0 : i32
    %c0_i32_1 = arith.constant 0 : i32
    return %c0_i32, %c0_i32_0 : i32, i32
  }
  func.func @transform_8(%arg0: i32) -> (i32, i32) {
    %c0_i32 = arith.constant 0 : i32
    %c0_i32_0 = arith.constant 0 : i32
    %c0_i32_1 = arith.constant 0 : i32
    return %c0_i32, %c0_i32_0 : i32, i32
  }
  func.func @transform_9(%arg0: i32) -> (i32, i32) {
    %c0_i32 = arith.constant 0 : i32
    %c0_i32_0 = arith.constant 0 : i32
    return %arg0, %c0_i32 : i32, i32
  }
}

</mosaic_0001>

<bundles_post_ra>
// kernel: digit_learner_forward.1
= control target key start
LH: loop header
LB: loop body
LE: loop exit
PB: predicated region body
PF: predicated region fallthrough
CT: control target
= control target key end

     0   :  { %14 = vsyncpa [#allocation3], 0  ;;  %s1152_s0 = inlined_call_operand.hbm [shape: f32[16,256], index: 0, kind: input, shape index: {}]   ;;  %s1153_s1 = inlined_call_operand.hbm [shape: bf16[256,128], index: 1, kind: input, shape index: {}]   ;;  %s1154_s2 = inlined_call_operand.vmem [shape: f32[1,128], index: 2, kind: input, shape index: {}]   ;;  %s1155_s3 = inlined_call_operand.hbm [shape: bf16[128,128], index: 3, kind: input, shape index: {}]   ;;  %s1156_s4 = inlined_call_operand.vmem [shape: f32[1,128], index: 4, kind: input, shape index: {}]   ;;  %s1157_s5 = inlined_call_operand.hbm [shape: bf16[128,128], index: 5, kind: input, shape index: {}]   ;;  %s1158_s6 = inlined_call_operand.vmem [shape: f32[1,128], index: 6, kind: input, shape index: {}]   ;;  %s1159_s7 = inlined_call_operand.hbm [shape: bf16[128,128], index: 7, kind: input, shape index: {}]   ;;  %s1160_s8 = inlined_call_operand.vmem [shape: f32[1,128], index: 8, kind: input, shape index: {}]   ;;  %s1161_s9 = inlined_call_operand.vmem [shape: bf16[16,128], index: 9, kind: output, shape index: {}]  }
   0x1   :  { %15 = vsyncpa [#allocation5], 0 }
   0x2   :  { %16 = vsyncpa [#allocation8], 0  ;;  %s974_s30 = smov [#allocation4]   ;;  %s858_s13 = scalar_lea.hbm %s1153_s1, 2048 }
   0x3   :  { %s34_s10 = sshll.u32 %s974_s30, 4  ;;  %p859_p0 = scmp.ne.s32.totalorder %s1153_s1, %s858_s13  ;;  %s35_s10 = int_to_ptr.vmem [resolvable:$true] %s34_s10 }
   0x4   :  { %p862_p1 = scmp.lt.u32.totalorder %s858_s13, %s1153_s1 }
   0x6   :  { %p864_p2 = pnand %p862_p1, %p859_p0 }
   0x8   :  { %867 = shalt.err (!%p864_p2)
}
   0x9   :  { %s868_s18 = scalar_lea.vmem %s35_s10, 2048  ;;  %p873_p4 = scmp.lt.s32.totalorder %s35_s10, %s35_s10 }
   0xa   :  { %p869_p3 = scmp.ne.s32.totalorder %s35_s10, %s868_s18  ;;  %p874_p5 = scmp.lt.s32.totalorder %s868_s18, %s868_s18 }
   0xc   :  { %p875_p6 = por %p874_p5, %p873_p4 }
   0xe   :  { %p876_p7 = pnand %p875_p6, %p869_p3 }
  0x10   :  { %879 = shalt.err (!%p876_p7)
}
  0x11   :  { %s975_s19 = smov 64   ;;  %s976_s20 = smov 4  }
  0x12   :  { %40 = dma.hbm_to_vmem [thread:$0]  %s1153_s1, 2048, %s35_s10, [#allocation5], %s975_s19, %s975_s19, %s976_s20  }
  0x13   :  { %s977_s23 = smov [#allocation7]   ;;  %s978_s25 = smov [#allocation2]  }
  0x14   :  { %s62_s24 = sshll.u32 %s977_s23, 4  ;;  %s22_s26 = sshll.u32 %s978_s25, 4  ;;  %s63_s24 = int_to_ptr.vmem [resolvable:$true] %s62_s24  ;;  %s23_s26 = int_to_ptr.vmem [resolvable:$true] %s22_s26 }
  0x15   :  { %s880_s29 = scalar_lea.hbm %s1157_s5, 1024 }
  0x16   :  { %p881_p8 = scmp.ne.s32.totalorder %s1157_s5, %s880_s29  ;;  %p884_p9 = scmp.lt.u32.totalorder %s880_s29, %s1157_s5 }
  0x18   :  { %p886_p10 = pnand %p884_p9, %p881_p8 }
  0x1a   :  { %889 = shalt.err (!%p886_p10)
}
  0x1b   :  { %s890_s1 = scalar_lea.vmem %s63_s24, 1024  ;;  %p895_p12 = scmp.lt.s32.totalorder %s63_s24, %s63_s24 }
  0x1c   :  { %p891_p11 = scmp.ne.s32.totalorder %s63_s24, %s890_s1  ;;  %p896_p13 = scmp.lt.s32.totalorder %s890_s1, %s890_s1 }
  0x1e   :  { %p897_p0 = por %p896_p13, %p895_p12 }
  0x20   :  { %p898_p1 = pnand %p897_p0, %p891_p11 }
  0x22   :  { %901 = shalt.err (!%p898_p1)
}
  0x23   :  { %68 = dma.hbm_to_vmem [thread:$0]  %s1157_s5, 1024, %s63_s24, [#allocation8], %s975_s19, %s975_s19, %s976_s20  }
  0x24   :  { %s902_s17 = scalar_lea.hbm %s1152_s0, 512 }
  0x25   :  { %p903_p2 = scmp.ne.s32.totalorder %s1152_s0, %s902_s17  ;;  %p906_p3 = scmp.lt.u32.totalorder %s902_s17, %s1152_s0 }
  0x27   :  { %p908_p4 = pnand %p906_p3, %p903_p2 }
  0x29   :  { %911 = shalt.err (!%p908_p4)
}
  0x2a   :  { %s912_s25 = scalar_lea.vmem %s23_s26, 512  ;;  %p917_p6 = scmp.lt.s32.totalorder %s23_s26, %s23_s26 }
  0x2b   :  { %p913_p5 = scmp.ne.s32.totalorder %s23_s26, %s912_s25  ;;  %p918_p7 = scmp.lt.s32.totalorder %s912_s25, %s912_s25 }
  0x2d   :  { %p919_p8 = por %p918_p7, %p917_p6 }
  0x2f   :  { %p920_p9 = pnand %p919_p8, %p913_p5 }
  0x31   :  { %923 = shalt.err (!%p920_p9)
}
  0x32   :  { %s979_s5 = smov 256   ;;  %s980_s24 = smov 16  }
  0x33   :  { %28 = dma.hbm_to_vmem [thread:$0]  %s1152_s0, 512, %s23_s26, [#allocation3], %s979_s5, %s979_s5, %s980_s24  }
  0x34   :  { %s981_s29 = smov [#allocation6]   ;;  %s982_s11 = smov [#allocation9]  }
  0x35   :  { %s48_s30 = sshll.u32 %s981_s29, 4  ;;  %s76_s12 = sshll.u32 %s982_s11, 4  ;;  %s49_s30 = int_to_ptr.vmem [resolvable:$true] %s48_s30  ;;  %s77_s12 = int_to_ptr.vmem [resolvable:$true] %s76_s12 }
  0x36   :  { %s924_s10 = scalar_lea.hbm %s1155_s3, 1024 }
  0x37   :  { %p925_p10 = scmp.ne.s32.totalorder %s1155_s3, %s924_s10  ;;  %p928_p11 = scmp.lt.u32.totalorder %s924_s10, %s1155_s3 }
  0x39   :  { %p930_p12 = pnand %p928_p11, %p925_p10 }
  0x3b   :  { %933 = shalt.err (!%p930_p12)
}
  0x3c   :  { %s934_s0 = scalar_lea.vmem %s49_s30, 1024  ;;  %p939_p0 = scmp.lt.s32.totalorder %s49_s30, %s49_s30 }
  0x3d   :  { %p935_p13 = scmp.ne.s32.totalorder %s49_s30, %s934_s0  ;;  %p940_p1 = scmp.lt.s32.totalorder %s934_s0, %s934_s0 }
  0x3f   :  { %p941_p2 = por %p940_p1, %p939_p0 }
  0x41   :  { %p942_p3 = pnand %p941_p2, %p935_p13 }
  0x43   :  { %945 = shalt.err (!%p942_p3)
}
  0x44   :  { %54 = dma.hbm_to_vmem [thread:$0]  %s1155_s3, 1024, %s49_s30, [#allocation5], %s975_s19, %s975_s19, %s976_s20  }
  0x45   :  { %s946_s23 = scalar_lea.hbm %s1159_s7, 1024 }
  0x46   :  { %p947_p4 = scmp.ne.s32.totalorder %s1159_s7, %s946_s23  ;;  %p950_p5 = scmp.lt.u32.totalorder %s946_s23, %s1159_s7 }
  0x48   :  { %p952_p6 = pnand %p950_p5, %p947_p4 }
  0x4a   :  { %955 = shalt.err (!%p952_p6)
}
  0x4b   :  { %s956_s28 = scalar_lea.vmem %s77_s12, 1024  ;;  %p961_p8 = scmp.lt.s32.totalorder %s77_s12, %s77_s12 }
  0x4c   :  { %p957_p7 = scmp.ne.s32.totalorder %s77_s12, %s956_s28  ;;  %p962_p9 = scmp.lt.s32.totalorder %s956_s28, %s956_s28 }
  0x4e   :  { %p963_p10 = por %p962_p9, %p961_p8 }
  0x50   :  { %p964_p11 = pnand %p963_p10, %p957_p7 }
  0x52   :  { %967 = shalt.err (!%p964_p11)
}
  0x53   :  { %82 = dma.hbm_to_vmem [thread:$0]  %s1159_s7, 1024, %s77_s12, [#allocation8], %s975_s19, %s975_s19, %s976_s20  }
  0x54   :  { %968 = dma.done.wait [#allocation3], 512  }
  0x55   :  { %969 = vsyncadd [#allocation3], 4294966784 }
  0x56   :  { %970 = dma.done.wait [#allocation5], 3072  }
  0x57   :  { %971 = vsyncadd [#allocation5], 4294964224 }
  0x58   :  { %972 = dma.done.wait [#allocation8], 2048  }
  0x59   :  { %973 = vsyncadd [#allocation8], 4294965248  ;;  %v983_v0 = vmov 0.0   ;;  %v818_v1 = vld [vmem:[#allocation4 + $0x40] sm:$0xff]   ;;  %v820_v3 = vld [vmem:[#allocation4 + $0x48] sm:$0xff]   ;;  %vm984_vm0 = vmmov 0  }
  0x5a   :  { %747 = vmatprep.subr.bf16.mxu1 %v983_v0  ;;  %v819_v2 = vld [vmem:[#allocation4] sm:$0xff]   ;;  %698 = vmatprep.subr.bf16.mxu0 %v818_v1  ;;  %v821_v4 = vld [vmem:[#allocation4 + $0x8] sm:$0xff]   ;;  %v822_v5 = vld [vmem:[#allocation4 + $0x50] sm:$0xff]  }
  0x5b   :  { %699 = vmatpush3.bf16.msra.mxu0 %v819_v2  ;;  %v823_v6 = vld [vmem:[#allocation4 + $0x10] sm:$0xff]   ;;  %v824_v7 = vld [vmem:[#allocation4 + $0x58] sm:$0xff]   ;;  %v826_v9 = vld [vmem:[#allocation4 + $0x60] sm:$0xff]   ;;  %763 = vmatprep.mubr.msk.bf16.mxu1 %vm984_vm0, %v983_v0 }
  0x5c   :  { %700 = vmatprep.subr.bf16.mxu0 %v820_v3  ;;  %v825_v8 = vld [vmem:[#allocation4 + $0x18] sm:$0xff]   ;;  %v827_v10 = vld [vmem:[#allocation4 + $0x20] sm:$0xff]   ;;  %v828_v11 = vld [vmem:[#allocation4 + $0x68] sm:$0xff]  }
  0x5d   :  { %v102_v12 = vld [vmem:[#allocation2 + $0x8] sm:$0xff]  ;;  %v104_v13 = vld [vmem:[#allocation2 + $0x18] sm:$0xff]  ;;  %v834_v16 = vld [vmem:[#allocation6] sm:$0xff]  }
  0x5e   :  { %v829_v14 = vld [vmem:[#allocation4 + $0x28] sm:$0xff]   ;;  %v106_v15 = vpack.c.bf16 %v104_v13, %v102_v12  ;;  %v830_v17 = vld [vmem:[#allocation4 + $0x70] sm:$0xff]   ;;  %748 = vmatpush3.bf16.msra.mxu1 %v834_v16  ;;  %v832_v20 = vld [vmem:[#allocation4 + $0x78] sm:$0xff]  }
  0x5f   :  { %701 = vmatpush3.bf16.msra.mxu0 %v821_v4  ;;  %v835_v18 = vld [vmem:[#allocation6 + $0x8] sm:$0xff]   ;;  %v831_v19 = vld [vmem:[#allocation4 + $0x30] sm:$0xff]   ;;  %749 = vmatprep.subr.bf16.mxu1 %v983_v0  ;;  %v833_v22 = vld [vmem:[#allocation4 + $0x38] sm:$0xff]  }
  0x60   :  { %702 = vmatprep.subr.bf16.mxu0 %v822_v5  ;;  %274 = vmatprep.mubr.bf16.mxu0 %v106_v15  ;;  %v836_v21 = vld [vmem:[#allocation6 + $0x10] sm:$0xff]   ;;  %v101_v23 = vld [vmem:[#allocation2] sm:$0xff]  ;;  %v837_v25 = vld [vmem:[#allocation6 + $0x18] sm:$0xff]  }
  0x61   :  { %v103_v24 = vld [vmem:[#allocation2 + $0x10] sm:$0xff]  ;;  %v838_v27 = vld [vmem:[#allocation6 + $0x20] sm:$0xff]   ;;  %v839_v28 = vld [vmem:[#allocation6 + $0x28] sm:$0xff]  }
  0x62   :  { %750 = vmatpush3.bf16.msra.mxu1 %v835_v18  ;;  %v105_v26 = vpack.c.bf16 %v103_v24, %v101_v23  ;;  %v840_v29 = vld [vmem:[#allocation6 + $0x30] sm:$0xff]   ;;  %v841_v30 = vld [vmem:[#allocation6 + $0x38] sm:$0xff]   ;;  %v842_v31 = vld [vmem:[#allocation7] sm:$0xff]  }
  0x63   :  { %703 = vmatpush3.bf16.msra.mxu0 %v823_v6  ;;  %751 = vmatprep.subr.bf16.mxu1 %v983_v0  ;;  %v843_v32 = vld [vmem:[#allocation7 + $0x8] sm:$0xff]   ;;  %v844_v33 = vld [vmem:[#allocation7 + $0x10] sm:$0xff]   ;;  %v845_v34 = vld [vmem:[#allocation7 + $0x18] sm:$0xff]  }
  0x64   :  { %704 = vmatprep.subr.bf16.mxu0 %v824_v7  ;;  %v846_v35 = vld [vmem:[#allocation7 + $0x20] sm:$0xff]   ;;  %v847_v36 = vld [vmem:[#allocation7 + $0x28] sm:$0xff]   ;;  %v848_v49 = vld [vmem:[#allocation7 + $0x30] sm:$0xff]  }
  0x65   :  { %v645_v38 = vld [vmem:[%s1154_s2] ss:$0 sm:$0xff]  ;;  %v849_v50 = vld [vmem:[#allocation7 + $0x38] sm:$0xff]   ;;  %v851_v52 = vld [vmem:[#allocation9 + $0x8] sm:$0xff]  }
  0x66   :  { %752 = vmatpush3.bf16.msra.mxu1 %v836_v21  ;;  %v850_v51 = vld [vmem:[#allocation9] sm:$0xff]   ;;  %v852_v53 = vld [vmem:[#allocation9 + $0x10] sm:$0xff]   ;;  %v853_v54 = vld [vmem:[#allocation9 + $0x18] sm:$0xff]  }
  0x67   :  { %705 = vmatpush3.bf16.msra.mxu0 %v825_v8  ;;  %753 = vmatprep.subr.bf16.mxu1 %v983_v0  ;;  %v854_v55 = vld [vmem:[#allocation9 + $0x20] sm:$0xff]   ;;  %v855_v56 = vld [vmem:[#allocation9 + $0x28] sm:$0xff]   ;;  %v856_v4 = vld [vmem:[#allocation9 + $0x30] sm:$0xff]  }
  0x68   :  { %706 = vmatprep.subr.bf16.mxu0 %v826_v9  ;;  %v662_v57 = vld [vmem:[%s1156_s4] ss:$0 sm:$0xff]  ;;  %v857_v5 = vld [vmem:[#allocation9 + $0x38] sm:$0xff]  }
  0x69   :  { %v671_v6 = vld [vmem:[%s1158_s6] ss:$0 sm:$0xff] }
  0x6a   :  { %754 = vmatpush3.bf16.msra.mxu1 %v837_v25 }
  0x6b   :  { %707 = vmatpush3.bf16.msra.mxu0 %v827_v10  ;;  %755 = vmatprep.subr.bf16.mxu1 %v983_v0 }
  0x6c   :  { %708 = vmatprep.subr.bf16.mxu0 %v828_v11 }
  0x6e   :  { %756 = vmatpush3.bf16.msra.mxu1 %v838_v27 }
  0x6f   :  { %709 = vmatpush3.bf16.msra.mxu0 %v829_v14  ;;  %757 = vmatprep.subr.bf16.mxu1 %v983_v0 }
  0x70   :  { %710 = vmatprep.subr.bf16.mxu0 %v830_v17 }
  0x72   :  { %758 = vmatpush3.bf16.msra.mxu1 %v839_v28 }
  0x73   :  { %711 = vmatpush3.bf16.msra.mxu0 %v831_v19  ;;  %759 = vmatprep.subr.bf16.mxu1 %v983_v0 }
  0x74   :  { %712 = vmatprep.subr.bf16.mxu0 %v832_v20 }
  0x76   :  { %760 = vmatpush3.bf16.msra.mxu1 %v840_v29 }
  0x77   :  { %713 = vmatpush3.bf16.msra.mxu0 %v833_v22  ;;  %761 = vmatprep.subr.bf16.mxu1 %v983_v0 }
  0x78   :  { %767 = vmatprep.subr.bf16.mxu0 %v983_v0 }
  0x7a   :  { %275 = vmatmul.mubr.bf16.vlgmr.msra.gmra.mrb[0].mxu0 %v105_v26  ;;  %762 = vmatpush3.bf16.msra.mxu1 %v841_v30 }
  0x7b   :  { %783 = vmatprep.mubr.msk.bf16.mxu0 %vm984_vm0, %v983_v0  ;;  %787 = vmatprep.subr.bf16.mxu1 %v983_v0 }
  0x7c   :  { %768 = vmatpush3.bf16.msra.mxu0 %v842_v31 }
  0x7d   :  { %769 = vmatprep.subr.bf16.mxu0 %v983_v0 }
  0x80   :  { %770 = vmatpush3.bf16.msra.mxu0 %v843_v32 }
  0x81   :  { %771 = vmatprep.subr.bf16.mxu0 %v983_v0 }
  0x84   :  { %772 = vmatpush3.bf16.msra.mxu0 %v844_v33 }
  0x85   :  { %773 = vmatprep.subr.bf16.mxu0 %v983_v0 }
  0x88   :  { %774 = vmatpush3.bf16.msra.mxu0 %v845_v34 }
  0x89   :  { %775 = vmatprep.subr.bf16.mxu0 %v983_v0 }
  0x8c   :  { %776 = vmatpush3.bf16.msra.mxu0 %v846_v35 }
  0x8d   :  { %777 = vmatprep.subr.bf16.mxu0 %v983_v0 }
  0x90   :  { %778 = vmatpush3.bf16.msra.mxu0 %v847_v36 }
  0x91   :  { %779 = vmatprep.subr.bf16.mxu0 %v983_v0 }
  0x94   :  { %780 = vmatpush3.bf16.msra.mxu0 %v848_v49 }
  0x95   :  { %781 = vmatprep.subr.bf16.mxu0 %v983_v0 }
  0x98   :  { %782 = vmatpush3.bf16.msra.mxu0 %v849_v50 }
 0x14d   :  { %v714_v37 = vpop.f32.mrb[0].mxu0 }
 0x14e   :  { %v715_v39 = vpop.f32.mrb[1].mxu0 }
 0x14f   :  { %v716_v40 = vadd.f32 %v715_v39, %v714_v37  ;;  %v717_v41 = vpop.f32.mrb[2].mxu0 }
 0x150   :  { %v718_v42 = vpop.f32.mrb[3].mxu0 }
 0x151   :  { %v277_v43 = vadd.f32 %v716_v40, %v645_v38  ;;  %v719_v44 = vadd.f32 %v718_v42, %v717_v41 }
 0x153   :  { %v280_v45 = vadd.f32 %v719_v44, %v645_v38  ;;  %v283_v46 = vmax.f32 %v277_v43, 0.0 }
 0x155   :  { %v284_v47 = vmax.f32 %v280_v45, 0.0 }
 0x157   :  { %v285_v48 = vpack.c.bf16 %v284_v47, %v283_v46 }
 0x159   :  { %764 = vmatmul.mubr.bf16.vlgmr.msra.gmra.mrb[0].mxu1 %v285_v48 }
 0x15a   :  { %803 = vmatprep.mubr.msk.bf16.mxu1 %vm984_vm0, %v983_v0  ;;  %788 = vmatpush3.bf16.msra.mxu1 %v850_v51 }
 0x15b   :  { %789 = vmatprep.subr.bf16.mxu1 %v983_v0 }
 0x15e   :  { %790 = vmatpush3.bf16.msra.mxu1 %v851_v52 }
 0x15f   :  { %791 = vmatprep.subr.bf16.mxu1 %v983_v0 }
 0x162   :  { %792 = vmatpush3.bf16.msra.mxu1 %v852_v53 }
 0x163   :  { %793 = vmatprep.subr.bf16.mxu1 %v983_v0 }
 0x166   :  { %794 = vmatpush3.bf16.msra.mxu1 %v853_v54 }
 0x167   :  { %795 = vmatprep.subr.bf16.mxu1 %v983_v0 }
 0x16a   :  { %796 = vmatpush3.bf16.msra.mxu1 %v854_v55 }
 0x16b   :  { %797 = vmatprep.subr.bf16.mxu1 %v983_v0 }
 0x16e   :  { %798 = vmatpush3.bf16.msra.mxu1 %v855_v56 }
 0x16f   :  { %799 = vmatprep.subr.bf16.mxu1 %v983_v0 }
 0x172   :  { %800 = vmatpush3.bf16.msra.mxu1 %v856_v4 }
 0x173   :  { %801 = vmatprep.subr.bf16.mxu1 %v983_v0  ;;  %v680_v0 = vld [vmem:[%s1160_s8] ss:$0 sm:$0xff] }
 0x176   :  { %802 = vmatpush3.bf16.msra.mxu1 %v857_v5 }
 0x22c   :  { %v391_v58 = vpop.f32.mrb[0].mxu1 }
 0x22d   :  { %v392_v59 = vadd.f32 %v662_v57, %v391_v58  ;;  %v765_v60 = vpop.f32.mrb[1].mxu1 }
 0x22e   :  { %v394_v61 = vpop.f32.mrb[2].mxu1 }
 0x22f   :  { %v395_v62 = vadd.f32 %v662_v57, %v394_v61  ;;  %v766_v63 = vpop.f32.mrb[3].mxu1  ;;  %v398_v1 = vmax.f32 %v392_v59, 0.0 }
 0x231   :  { %v399_v2 = vmax.f32 %v395_v62, 0.0 }
 0x233   :  { %v400_v3 = vpack.c.bf16 %v399_v2, %v398_v1 }
 0x235   :  { %784 = vmatmul.mubr.bf16.vlgmr.msra.gmra.mrb[4].mxu0 %v400_v3 }
 0x308   :  { %v506_v7 = vpop.f32.mrb[4].mxu0 }
 0x309   :  { %v507_v8 = vadd.f32 %v671_v6, %v506_v7  ;;  %v785_v9 = vpop.f32.mrb[5].mxu0 }
 0x30a   :  { %v509_v10 = vpop.f32.mrb[6].mxu0 }
 0x30b   :  { %v510_v11 = vadd.f32 %v671_v6, %v509_v10  ;;  %v786_v12 = vpop.f32.mrb[7].mxu0  ;;  %v513_v13 = vmax.f32 %v507_v8, 0.0 }
 0x30d   :  { %v514_v14 = vmax.f32 %v510_v11, 0.0 }
 0x30f   :  { %v515_v15 = vpack.c.bf16 %v514_v14, %v513_v13 }
 0x311   :  { %804 = vmatmul.mubr.bf16.vlgmr.msra.gmra.mrb[4].mxu1 %v515_v15 }
 0x3e4   :  { %v621_v16 = vpop.f32.mrb[4].mxu1 }
 0x3e5   :  { %v805_v17 = vpop.f32.mrb[5].mxu1  ;;  %v622_v19 = vadd.f32 %v680_v0, %v621_v16 }
 0x3e6   :  { %v624_v18 = vpop.f32.mrb[6].mxu1 }
 0x3e7   :  { %v625_v20 = vadd.f32 %v680_v0, %v624_v18  ;;  %v806_v21 = vpop.f32.mrb[7].mxu1 }
 0x3e9   :  { %v696_v22 = vpack.c.bf16 %v625_v20, %v622_v19 }
 0x3eb   :  { %697 = vst [vmem:[%s1161_s9] sm:$0xff] %v696_v22  }
 0x3ec   :  { %642 = vsyncpa [#allocation3], 1 }
 0x3ed   :  { %643 = vsyncpa [#allocation5], 1 }
 0x3ee   :  { %644 = vsyncpa [#allocation8], 1 }

</bundles_post_ra>
